<compile_context>
chip_gen: v6e
topology: v6e:2x2x1
jax: 0.10.0
libtpu: 0.0.40
codegen_flags: <defaults>
</compile_context>

<pallas_src>
import jax
import jax.numpy as jnp
import numpy as np
from jax.experimental import pallas as pl
from jax.experimental.pallas import tpu as pltpu


def _pair(v):
    return tuple(v) if isinstance(v, (tuple, list)) else (v, v)


# ---------------------------------------------------------------------------
# Pallas kernel: for one (n, g) block, sum the C//G input channels (f32
# accumulation) and broadcast the result to all O//G output channels.
# ---------------------------------------------------------------------------
def _group_channel_sum_kernel(x_ref, o_ref):
    # x_ref: (1, Cg, TL)   o_ref: (1, Og, TL)   (lanes = flattened H*W)
    s = jnp.sum(x_ref[...].astype(jnp.float32), axis=1, keepdims=True)  # (1,1,TL)
    o_ref[...] = jnp.broadcast_to(s, o_ref.shape).astype(o_ref.dtype)


def identity_conv2d(x, out_channels, kernel_size, *, groups=1, stride=1,
                    padding=0, dilation=1):
    N, C, H, W = x.shape
    KH, KW = _pair(kernel_size)
    SH, SW = _pair(stride)
    DH, DW = _pair(dilation)
    if isinstance(padding, str):
        if padding == "valid":
            PH, PW = 0, 0
        elif padding == "same":
            PH, PW = DH * (KH - 1) // 2, DW * (KW - 1) // 2
        else:
            raise ValueError(f"unsupported padding: {padding}")
    else:
        PH, PW = _pair(padding)

    assert C % groups == 0 and out_channels % groups == 0
    Cg = C // groups
    Og = out_channels // groups

    # F.conv2d output-shape semantics.
    H_out = (H + 2 * PH - DH * (KH - 1) - 1) // SH + 1
    W_out = (W + 2 * PW - DW * (KW - 1) - 1) // SW + 1
    assert H_out > 0 and W_out > 0

    # Center-tap source offset in the unpadded input (PyTorch center = K//2).
    off_h = DH * (KH // 2) - PH
    off_w = DW * (KW // 2) - PW
    last_h = (H_out - 1) * SH + off_h
    last_w = (W_out - 1) * SW + off_w

    # ---- select the center-tap window (stride handled here, not in-kernel) ----
    if (off_h == 0 and off_w == 0 and SH == 1 and SW == 1
            and H_out == H and W_out == W):
        x_sel = x                                   # common "same" case: zero-copy
    elif off_h >= 0 and off_w >= 0 and last_h < H and last_w < W:
        # In-bounds strided window: strided slice, no zero-padded copy of x.
        x_sel = jax.lax.slice(
            x, (0, 0, off_h, off_w), (N, C, last_h + 1, last_w + 1),
            (1, 1, SH, SW))
    else:
        # TODO(synk): rare case (padding > dilation*(K//2)); a minimal zero-pad
        # copy is used instead of in-kernel edge masking.
        plo_h, phi_h = max(0, -off_h), max(0, last_h - (H - 1))
        plo_w, phi_w = max(0, -off_w), max(0, last_w - (W - 1))
        xp = jnp.pad(x, ((0, 0), (0, 0), (plo_h, phi_h), (plo_w, phi_w)))
        sh0, sw0 = off_h + plo_h, off_w + plo_w
        x_sel = jax.lax.slice(
            xp, (0, 0, sh0, sw0),
            (N, C, sh0 + (H_out - 1) * SH + 1, sw0 + (W_out - 1) * SW + 1),
            (1, 1, SH, SW))

    # Fully-degenerate (depthwise identity) case: output IS the selected window;
    # skip the kernel launch entirely (zero-copy when stride==1, "same" padding).
    if Cg == 1 and Og == 1:
        return x_sel

    NG = N * groups
    L = H_out * W_out
    itemsize = np.dtype(x.dtype).itemsize

    # Lane-dense layout: channels on sublanes, flattened spatial on lanes.
    x_flat = x_sel.reshape(NG, Cg, L)

    # Largest lane tile (multiple of 128) whose double-buffered in+out blocks
    # stay well under a v7x-safe VMEM budget; full L when it already fits.
    budget_bytes = 8 * 1024 * 1024
    per_lane = 2 * (Cg + Og) * itemsize            # 2 = double buffering
    max_tl = max(128, (budget_bytes // per_lane) // 128 * 128)
    TL = L if L <= max_tl else max_tl              # full-dim block is always legal
    grid = (NG, pl.cdiv(L, TL))

    out_flat = pl.pallas_call(
        _group_channel_sum_kernel,
        out_shape=jax.ShapeDtypeStruct((NG, Og, L), x.dtype),
        grid_spec=pltpu.PrefetchScalarGridSpec(
            num_scalar_prefetch=0,
            grid=grid,
            in_specs=[pl.BlockSpec((1, Cg, TL), lambda b, l: (b, 0, l))],
            out_specs=pl.BlockSpec((1, Og, TL), lambda b, l: (b, 0, l)),
        ),
        compiler_params=pltpu.CompilerParams(
            dimension_semantics=("parallel", "parallel")),
        cost_estimate=pl.CostEstimate(
            flops=NG * Cg * L,
            transcendentals=0,
            bytes_accessed=(NG * Cg * L + NG * Og * L) * itemsize),
    )(x_flat)

    return out_flat.reshape(N, out_channels, H_out, W_out)


class IdentityConv2d:
    """JAX/Pallas port of the PyTorch IdentityConv2d module (forward only)."""

    def __init__(self, in_channels, out_channels, **kwargs):
        self.in_channels = in_channels
        self.out_channels = out_channels
        self.kernel_size = kwargs.pop("kernel_size")
        self.groups = kwargs.get("groups", 1)
        self.stride = kwargs.get("stride", 1)
        self.padding = kwargs.get("padding", 0)
        self.dilation = kwargs.get("dilation", 1)

    def __call__(self, x):
        return identity_conv2d(
            x, self.out_channels, self.kernel_size,
            groups=self.groups, stride=self.stride,
            padding=self.padding, dilation=self.dilation)


# ---------------------------------------------------------------------------
# Pure-JAX reference (explicitly builds the PyTorch weight and runs conv).
# ---------------------------------------------------------------------------
def _reference(x, out_channels, kernel_size, *, groups, stride, padding, dilation):
    C = x.shape[1]
    KH, KW = _pair(kernel_size)
    SH, SW = _pair(stride)
    DH, DW = _pair(dilation)
    PH, PW = _pair(padding)
    w = np.zeros((KH, KW), np.float32)
    w[KH // 2, KW // 2] = 1.0
    w = np.tile(w[None, None], (out_channels, C // groups, 1, 1))
    return jax.lax.conv_general_dilated(
        x, jnp.asarray(w, x.dtype),
        window_strides=(SH, SW),
        padding=((PH, PH), (PW, PW)),
        rhs_dilation=(DH, DW),
        dimension_numbers=("NCHW", "OIHW", "NCHW"),
        feature_group_count=groups)


if __name__ == "__main__":
    key = jax.random.PRNGKey(0)
    x = jax.random.normal(key, (2, 4, 16, 16), dtype=jnp.float32)

    # Config 1: grouped 3x3 "same" identity conv (zero-copy wrapper, L=256 lanes).
    conv1 = IdentityConv2d(4, 4, kernel_size=3, groups=2, stride=1, padding=1)
    out1 = jax.block_until_ready(conv1(x))
    ref1 = _reference(x, 4, 3, groups=2, stride=1, padding=1, dilation=1)
    np.testing.assert_allclose(np.asarray(out1), np.asarray(ref1),
                               rtol=1e-6, atol=1e-6)

    # Config 2: stride-2 path (strided center-tap window selected in the wrapper).
    conv2 = IdentityConv2d(4, 4, kernel_size=3, groups=1, stride=2, padding=1)
    out2 = jax.block_until_ready(conv2(x))
    ref2 = _reference(x, 4, 3, groups=1, stride=2, padding=1, dilation=1)
    np.testing.assert_allclose(np.asarray(out2), np.asarray(ref2),
                               rtol=1e-6, atol=1e-6)

    print("KERNEL_OK")
</pallas_src>

<mosaic_0001>
module attributes {stable_mosaic.version = 11 : i64} {
  func.func @_group_channel_sum_kernel(%arg0: i32, %arg1: i32, %arg2: memref<1x2x256xf32, #tpu.memory_space<vmem>>, %arg3: memref<1x2x256xf32, #tpu.memory_space<vmem>>) attributes {dimension_semantics = [#tpu.dimension_semantics<parallel>, #tpu.dimension_semantics<parallel>], iteration_bounds = array<i64: 4, 1>, scalar_prefetch = 0 : i64, scratch_operands = 0 : i64, tpu.core_type = #tpu.core_type<tc>, window_params = [{transform_indices = @transform_0, window_bounds = array<i64: 1, 2, 256>}, {transform_indices = @transform_1, window_bounds = array<i64: 1, 2, 256>}]} {
    %c0 = arith.constant 0 : index
    %c0_0 = arith.constant 0 : index
    %c0_1 = arith.constant 0 : index
    %0 = vector.load %arg2[%c0, %c0_0, %c0_1] : memref<1x2x256xf32, #tpu.memory_space<vmem>>, vector<1x2x256xf32>
    %cst = arith.constant dense<0.000000e+00> : vector<1x256xf32>
    %1 = vector.multi_reduction <add>, %0, %cst [1] : vector<1x2x256xf32> to vector<1x256xf32>
    %2 = vector.shape_cast %1 : vector<1x256xf32> to vector<1x1x256xf32>
    %3 = vector.shape_cast %2 : vector<1x1x256xf32> to vector<1x1x256xf32>
    %4 = vector.broadcast %3 : vector<1x1x256xf32> to vector<1x2x256xf32>
    %c0_2 = arith.constant 0 : index
    %c0_3 = arith.constant 0 : index
    %c0_4 = arith.constant 0 : index
    %5 = vector.load %arg3[%c0_2, %c0_3, %c0_4] : memref<1x2x256xf32, #tpu.memory_space<vmem>>, vector<1x2x256xf32>
    tpu.vector_store %arg3[%c0_2, %c0_3, %c0_4], %4 {strides = array<i32>} : memref<1x2x256xf32, #tpu.memory_space<vmem>>, vector<1x2x256xf32>,
    return
  }
  func.func @transform_0(%arg0: i32, %arg1: i32) -> (i32, i32, i32) {
    %c0_i32 = arith.constant 0 : i32
    %c0_i32_0 = arith.constant 0 : i32
    return %arg0, %c0_i32, %arg1 : i32, i32, i32
  }
  func.func @transform_1(%arg0: i32, %arg1: i32) -> (i32, i32, i32) {
    %c0_i32 = arith.constant 0 : i32
    %c0_i32_0 = arith.constant 0 : i32
    return %arg0, %c0_i32, %arg1 : i32, i32, i32
  }
}

</mosaic_0001>

<bundles_post_ra>
// kernel: tpu_custom_call.1
= control target key start
LH: loop header
LB: loop body
LE: loop exit
PB: predicated region body
PF: predicated region fallthrough
CT: control target
= control target key end

     0   :  { %6 = vsyncpa [#allocation3], 0  ;;  %s628_s0 = inlined_call_operand.hbm [shape: f32[4,2,256], index: 0, kind: input, shape index: {}]   ;;  %s629_s1 = inlined_call_operand.hbm [shape: f32[4,2,256], index: 1, kind: output, shape index: {}]  }
   0x1   :  { %8 = vsyncpa [#allocation3 + $0x1], 0 }
   0x2   :  { %9 = vsyncpa [#allocation4], 0 }
   0x3   :  { %11 = vsyncpa [#allocation4 + $0x1], 0  ;;  %s496_s6 = smov 0   ;;  %s498_s7 = smov 0  }
   0x4   :  { %s500_s8 = smov 0   ;;  %s502_s9 = smov 0  }
   0x5   :  { %s504_s10 = smov 0   ;;  %s506_s11 = smov 0  }
   0x6 LB: > { %s293_s12 = sadd.s32 4294967295, %s482_s11   ;;  %s294_s13 = sadd.s32 4294967294, %s482_s11   ;;  %s482_s11 = sphi %s506_s11, %s17_s11   ;;  %s478_s10 = sphi %s504_s10, %s640_s10   ;;  %s474_s9 = sphi %s502_s9, %s639_s9   ;;  %s470_s8 = sphi %s500_s8, %s638_s8   ;;  %s466_s7 = sphi %s498_s7, %s637_s7   ;;  %s462_s6 = sphi %s496_s6, %s636_s6  }
   0x7   : > { %s29_s14 = sadd.s32 1, %s478_s10  ;;  %s38_s15 = sadd.s32 1, %s470_s8 }
   0x8   : > { %p31_p0 = scmp.ge.s32.totalorder %s29_s14, 4  ;;  %p45_p1 = scmp.ne.s32.totalorder %s470_s8, %s466_s7 }
   0x9   : > { %p46_p2 = scmp.eq.s32.totalorder %s482_s11, 0  ;;  %p51_p3 = scmp.ne.s32.totalorder %s466_s7, %s462_s6 }
   0xa   : > { %s642_s14 = smov (%p31_p0, %s29_s14), 0  ;;  %p52_p5 = scmp.eq.s32.totalorder %s293_s12, 0 }
   0xb   : > { %p537_p4 = por %p46_p2, %p45_p1  ;;  %s33_s17 = ssub.s32 %s478_s10, %s642_s14 }
   0xc   : > { %p77_p6 = scmp.eq.s32.totalorder %s293_s12, 3  ;;  %p36_p7 = scmp.eq.s32.totalorder %s33_s17, 0 }
   0xd   : > { %p543_p8 = por %p52_p5, %p51_p3  ;;  %p83_p10 = scmp.eq.s32.totalorder %s294_s13, 3 }
   0xe   : > { %p547_p9 = por %p77_p6, %p45_p1  ;;  %p324_p12 = scmp.lt.s32.totalorder %s482_s11, 4 }
   0xf   : > { %s552_s20 = scalar_select %p36_p7, %s470_s8, %s38_s15  }
  0x10   : > { %p554_p11 = por %p83_p10, %p51_p3  ;;  %s103_s22 = sand.u32 1, %s470_s8  }
  0x11   : > { %s297_s23 = sshll.u32 %s103_s22, 2  ;;  %s310_s24 = sshll.u32 %s478_s10, 6 }
  0x12   : > { %s633_s21 = scalar_select %p554_p11, 1, 0 }
  0x13   : > { %s115_s27 = scalar_lea.hbm %s628_s0, %s310_s24  ;;  %s107_s28 = scalar_lea.vmem [#allocation2], %s297_s23 }
  0x14   : > { %s117_s29 = sshll.u32 %s107_s28, 4  ;;  %p566_p13 = pnand %p324_p12, %p537_p4  ;;  %s118_s29 = int_to_ptr.vmem [resolvable:$true] %s117_s29 }
  0x15   : > { %p300_p0 = scmp.ge.s32.totalorder %s482_s11, 1  ;;  %p122_p1 = scmp.lt.s32.totalorder %s482_s11, 5 }
  0x16   : > { %s104_s2 = scalar_lea.sflag [#allocation3], %s103_s22  ;;  %p376_p2 = pneg %p566_p13 }
  0x17   : > { %s387_s3 = scalar_lea.vmem %s118_s29, 64  ;;  %s484_s4 = smov [#allocation2]  }
  0x18   : > { %p388_p3 = scmp.ne.s32.totalorder %s118_s29, %s387_s3  ;;  %s392_s5 = sshll.u32 %s484_s4, 4  ;;  %s393_s5 = int_to_ptr.vmem [resolvable:$false] %s392_s5 }
  0x19   : > { %s394_s12 = scalar_lea.vmem %s393_s5, 128  ;;  %p395_p7 = scmp.lt.s32.totalorder %s118_s29, %s393_s5 }
  0x1a   : > { %p390_p5 = pnand %p388_p3, %p376_p2  ;;  %p396_p10 = scmp.lt.s32.totalorder %s394_s12, %s387_s3 }
  0x1c   : > { %p391_p6 = pneg %p390_p5  ;;  %p397_p4 = por %p396_p10, %p395_p7 }
  0x1e   : > { %p398_p12 = pnand %p397_p4, %p391_p6 }
  0x20   : > { %401 = shalt.err (!%p398_p12)
}
  0x21   : > { %319 = dma.hbm_to_vmem [thread:$0]  (!%p566_p13), %s115_s27, 64, %s118_s29, %s104_s2  }
  0x22   : > { %p123_p11 = pnand %p300_p0, %p122_p1 }
  0x23   : > { %s581_s13 = sand.u32 (!%p123_p11), 1, %s466_s7  }
  0x24   : > { %126 = sbr.rel (%p123_p11) target bundleno = 73 (0x49), region = 24  ;;  %s301_s15 = sshll.u32 (!%p123_p11), %s581_s13, 2 }
  0x25   : > { %s129_s16 = scalar_lea.sflag (!%p123_p11), [#allocation3], %s581_s13  ;;  %s132_s17 = scalar_lea.vmem (!%p123_p11), [#allocation2], %s301_s15 }
  0x29   : > { %453 = dma.done.wait (%p543_p8), %s129_s16, 64  }
  0x2a   : > { %455 = vsyncadd (%p543_p8), %s129_s16, 4294967232  ;;  %vm165_vm0 = vcmask 1041408   ;;  %v303_v0 = vld.sshfl [vmem:[%s132_s17] sm:$0x33 pattern:$0x76325410] }
  0x2b   : > { %v162_v1 = vcombine.high %v303_v0, %v303_v0  ;;  %v166_v2 = vsel %vm165_vm0, %v303_v0, 0.0  ;;  %s150_s18 = scalar_lea.vmem [#allocation5], %s301_s15  ;;  %s311_s23 = sshll.u32 %s474_s9, 6 }
  0x2c   : > { %v167_v3 = vrot.slane %v166_v2, 4  ;;  %s209_s22 = sshll.u32 %s150_s18, 4  ;;  %s207_s26 = scalar_lea.hbm %s629_s1, %s311_s23  ;;  %s210_s22 = int_to_ptr.vmem [resolvable:$true] %s209_s22 }
  0x2d   : > { %v173_v4 = vsel %vm165_vm0, %v162_v1, 0.0  ;;  %s193_s27 = scalar_lea.sflag [#allocation4], %s581_s13  ;;  %s402_s28 = scalar_lea.vmem %s210_s22, 64 }
  0x2e   : > { %v168_v5 = vadd.f32 %v167_v3, %v166_v2  ;;  %v174_v6 = vrot.slane %v173_v4, 4  ;;  %p403_p8 = scmp.ne.s32.totalorder %s210_s22, %s402_s28  ;;  %s485_s29 = smov [#allocation5]  }
  0x2f   : > { %s406_s30 = sshll.u32 %s485_s29, 4  ;;  %s407_s30 = int_to_ptr.vmem [resolvable:$false] %s406_s30 }
  0x30   : > { %v169_v7 = vrot.slane %v168_v5, 2  ;;  %v175_v8 = vadd.f32 %v174_v6, %v173_v4  ;;  %p404_p11 = pnand %p403_p8, %p547_p9  ;;  %s408_s2 = scalar_lea.vmem %s407_s30, 128 }
  0x31   : > { %p409_p0 = scmp.lt.s32.totalorder %s210_s22, %s407_s30  ;;  %p410_p1 = scmp.lt.s32.totalorder %s408_s2, %s402_s28 }
  0x32   : > { %v170_v9 = vadd.f32 %v169_v7, %v168_v5  ;;  %v176_v10 = vrot.slane %v175_v8, 2  ;;  %p405_p13 = pneg %p404_p11 }
  0x33   : > { %p411_p2 = por %p410_p1, %p409_p0 }
  0x34   : > { %v171_v11 = vrot.slane %v170_v9, 1  ;;  %v177_v12 = vadd.f32 %v176_v10, %v175_v8 }
  0x35   : > { %p412_p3 = pnand %p411_p2, %p405_p13 }
  0x36   : > { %v172_v13 = vadd.f32 %v171_v11, %v170_v9  ;;  %v178_v14 = vrot.slane %v177_v12, 1 }
  0x38   : > { %v179_v15 = vadd.f32 %v178_v14, %v177_v12 }
  0x3a   : > { %v182_v16 = vcombine.low %v172_v13, %v179_v15 }
  0x3c   : > { %304 = vst.sshfl [vmem:[%s150_s18] sm:$0x33 pattern:$0x76325410] %v182_v16 }
  0x3d   : > { %415 = shalt.err (!%p412_p3)
}
  0x3e   : > { %s416_s9 = scalar_lea.hbm %s207_s26, 64  ;;  %s420_s5 = scalar_lea.hbm %s629_s1, 256 }
  0x3f   : > { %p417_p5 = scmp.ne.s32.totalorder %s207_s26, %s416_s9  ;;  %p421_p10 = scmp.lt.s32.totalorder %s207_s26, %s629_s1 }
  0x40   : > { %p422_p4 = scmp.lt.s32.totalorder %s420_s5, %s416_s9 }
  0x41   : > { %p418_p6 = pnand %p417_p5, %p547_p9 }
  0x42   : > { %p423_p12 = por %p422_p4, %p421_p10 }
  0x43   : > { %p419_p7 = pneg %p418_p6 }
  0x45   : > { %p424_p8 = pnand %p423_p12, %p419_p7 }
  0x47   : > { %427 = shalt.err (!%p424_p8)
}
  0x48   : > { %314 = dma.vmem_to_hbm [thread:$0]  (%p547_p9), %s210_s22, 64, %s207_s26, %s193_s27  }
  0x49 PF: > { %p325_p11 = scmp.ge.s32.totalorder %s482_s11, 2  ;;  %s221_s15 = sand.u32 1, %s462_s6  }
  0x4a   : > { %p635_p13 = scmp.ne.s32.totalorder %s633_s21, 0  ;;  %s222_s16 = scalar_lea.sflag [#allocation4], %s221_s15 }
  0x4c   : > { %p321_p0 = pnand %p325_p11, %p635_p13 }
  0x4e   : > { %p322_p1 = pneg %p321_p0 }
  0x50   : > { %457 = dma.done.wait (%p322_p1), %s222_s16, 64  }
  0x51   : > { %459 = vsyncadd (%p322_p1), %s222_s16, 4294967232  ;;  %s17_s11 = sadd.s32 1, %s482_s11   ;;  %s636_s6 = smov %s466_s7 }
  0x52   : > { %p14_p2 = scmp.ge.s32.totalorder %s17_s11, 6   ;;  %s637_s7 = smov %s470_s8 }
  0x53   : > { %s638_s8 = smov %s552_s20  ;;  %s639_s9 = smov %s478_s10 }
  0x54   : > { %s640_s10 = smov %s642_s14  ;;  %16 = sbr.rel (!%p14_p2) target bundleno = 6 (0x6), region = 69 }
  0x59   :  { %227 = vsyncpa [#allocation3], 1 }
  0x5a   :  { %229 = vsyncpa [#allocation3 + $0x1], 1 }
  0x5b   :  { %230 = vsyncpa [#allocation4], 1 }
  0x5c   :  { %232 = vsyncpa [#allocation4 + $0x1], 1 }

</bundles_post_ra>
